<compile_context>
chip_gen: v6e
topology: v6e:2x2x1
jax: 0.10.0
libtpu: 0.0.40
codegen_flags: <defaults>
</compile_context>

<pallas_src>
import functools
import math

import jax
import jax.numpy as jnp
import numpy as np
from jax.experimental import pallas as pl
from jax.experimental.pallas import tpu as pltpu

TWO_PI = 2.0 * math.pi


def _round_up(x, m):
    return ((x + m - 1) // m) * m


def _vmem_capacity_bytes():
    try:
        info = pltpu.get_tpu_info()
        cap = getattr(info, "vmem_capacity_bytes", None)
        if cap:
            return int(cap)
    except Exception:
        pass
    return 64 * 1024 * 1024  # conservative fallback (v7x per-TC VMEM)


def _pick_lane_tile(M, per_lane_bytes, vmem_budget_bytes, max_lane_tile=None):
    """Largest lane tile (multiple of 128) whose footprint fits the budget, with
    bounded padding waste. Returns (TM, Mp) with Mp % TM == 0 and Mp >= M."""
    m128 = _round_up(max(M, 1), 128)
    cap = 128
    for cand in (2048, 1024, 512, 256, 128):
        if cand * per_lane_bytes <= vmem_budget_bytes:
            cap = cand
            break
    if max_lane_tile is not None:
        cap = max(128, min(cap, (max_lane_tile // 128) * 128))
    n_tiles = -(-m128 // cap)                       # grid length
    tm = _round_up(-(-m128 // n_tiles), 128)        # per-tile lanes (<= cap)
    return tm, n_tiles * tm


def _channel_apply_kernel(tt_ref, ff_ref, nu_ref, tau_ref, btx_ref, crx_ref,
                          x_ref, y_ref, *, batch, lp, ntp2, nrp2):
    tt = tt_ref[...]       # (1, TM)   time of each grid point (k / scs)
    ff = ff_ref[...]       # (1, TM)   fftshifted carrier frequency of each grid point
    nu = nu_ref[...]       # (Lp, 1)   doppler shifts (zero-padded)
    tau = tau_ref[...]     # (Lp, 1)   path delays    (zero-padded)

    # omega[l, m] = exp(j * 2*pi*(nu_l * t_m - tau_l * f_m))
    phase = TWO_PI * (nu * tt - tau * ff)           # (Lp, TM)
    wr = jnp.cos(phase)
    wi = jnp.sin(phase)

    btx = btx_ref[...]     # (2*Lp, 2*Ntp)  [[Br,-Bi],[Bi,Br]], B[l,j] = conj(Atx[l,j])
    crx = crx_ref[...]     # (2*Nrp, 2*Lp)  [[Cr,-Ci],[Ci,Cr]], C[i,l] = g_l * Arx[l,i]

    # Static unroll over the (small) batch; omega is shared across batches.
    for b in range(batch):
        # x rows for batch b: [xr (Ntp rows); xi (Ntp rows)] -> aligned full-tile view.
        x2 = x_ref[pl.ds(b * ntp2, ntp2), :]                           # (2*Ntp, TM)
        # v = conj(Atx) @ x   (fused complex matmul)
        v2 = jnp.dot(btx, x2, preferred_element_type=jnp.float32)      # (2*Lp, TM)
        vr = v2[:lp, :]
        vi = v2[lp:, :]
        # u = omega * v       (complex elementwise)
        ur = wr * vr - wi * vi
        ui = wr * vi + wi * vr
        u2 = jnp.concatenate([ur, ui], axis=0)                         # (2*Lp, TM)
        # y = (g * Arx) @ u   (fused complex matmul)
        y_ref[pl.ds(b * nrp2, nrp2), :] = jnp.dot(
            crx, u2, preferred_element_type=jnp.float32)               # (2*Nrp, TM)


def ofdm_beamspace_channel_apply(signal_in, path_gains, path_delays,
                                 doppler_shifts, Arx, Atx, subcarrier_spacing,
                                 max_lane_tile=None):
    """signal_in: complex64 [B, Nt, Nfft, Nsym] (DC in middle) -> complex64 [B, Nr, Nfft, Nsym]."""
    B, Nt, Nfft, Nsym = signal_in.shape
    Nr = Arx.shape[1]
    L = path_gains.shape[0]
    M = Nfft * Nsym

    Lp = max(8, _round_up(L, 8))
    Ntp = max(8, _round_up(Nt, 8))
    Nrp = max(8, _round_up(Nr, 8))

    # ---- lane-tile / VMEM budget selection (generation aware) ----
    vmem_cap = _vmem_capacity_bytes()
    # streamed bytes per lane (double-buffered) + in-kernel f32 intermediates per lane
    per_lane = 4 * (2 * (2 + B * 2 * Ntp + B * 2 * Nrp) + 8 * Lp)
    TM, Mp = _pick_lane_tile(M, per_lane, vmem_cap // 4, max_lane_tile)
    grid = (Mp // TM,)
    block_bytes = TM * per_lane + (2 << 20)
    vmem_limit = int(min(vmem_cap * 3 // 4, max(32 << 20, 2 * block_bytes)))

    # ---- tiny constant matrices (glue) ----
    # Tx combine:  B[l,j] = conj(Atx[l,j])  ->  [[Br,-Bi],[Bi,Br]]
    Btx = jnp.zeros((Lp, Ntp), jnp.complex64)
    Btx = Btx.at[:L, :Nt].set(jnp.conj(Atx).astype(jnp.complex64))
    Br = jnp.real(Btx).astype(jnp.float32)
    Bi = jnp.imag(Btx).astype(jnp.float32)
    Btx2 = jnp.block([[Br, -Bi], [Bi, Br]])                 # (2*Lp, 2*Ntp)

    # Rx combine:  C[i,l] = g_l * Arx[l,i]  ->  [[Cr,-Ci],[Ci,Cr]]
    Cmat = jnp.zeros((Nrp, Lp), jnp.complex64)
    if L > 0:
        Cmat = Cmat.at[:Nr, :L].set(
            (path_gains[:, None] * Arx).T.astype(jnp.complex64))
    Cr = jnp.real(Cmat).astype(jnp.float32)
    Ci = jnp.imag(Cmat).astype(jnp.float32)
    Crx2 = jnp.block([[Cr, -Ci], [Ci, Cr]])                 # (2*Nrp, 2*Lp)

    nu = jnp.zeros((Lp, 1), jnp.float32).at[:L, 0].set(doppler_shifts.astype(jnp.float32))
    tau = jnp.zeros((Lp, 1), jnp.float32).at[:L, 0].set(path_delays.astype(jnp.float32))

    # Time per symbol and carrier frequency with fftshift folded in (DC in the middle).
    # Grid points flattened as m = carrier * Nsym + symbol; padded lanes are zeros.
    t_vec = jnp.arange(Nsym, dtype=jnp.float32) / subcarrier_spacing
    f_vec = jnp.fft.fftshift(jnp.arange(Nfft, dtype=jnp.float32) * subcarrier_spacing)
    tt_full = jnp.broadcast_to(t_vec[None, :], (Nfft, Nsym)).reshape(M)
    ff_full = jnp.broadcast_to(f_vec[:, None], (Nfft, Nsym)).reshape(M)
    tt = jnp.zeros((1, Mp), jnp.float32).at[0, :M].set(tt_full)
    ff = jnp.zeros((1, Mp), jnp.float32).at[0, :M].set(ff_full)

    # Input: rows = (batch, [re | im], tx antenna padded to Ntp), lanes = OFDM grid padded to Mp.
    xr = jnp.real(signal_in).astype(jnp.float32).reshape(B, Nt, M)
    xi = jnp.imag(signal_in).astype(jnp.float32).reshape(B, Nt, M)
    x = jnp.zeros((B, 2 * Ntp, Mp), jnp.float32)
    x = x.at[:, :Nt, :M].set(xr)
    x = x.at[:, Ntp:Ntp + Nt, :M].set(xi)
    x = x.reshape(B * 2 * Ntp, Mp)

    kernel = functools.partial(_channel_apply_kernel,
                               batch=B, lp=Lp, ntp2=2 * Ntp, nrp2=2 * Nrp)

    y = pl.pallas_call(
        kernel,
        out_shape=jax.ShapeDtypeStruct((B * 2 * Nrp, Mp), jnp.float32),
        grid_spec=pltpu.PrefetchScalarGridSpec(
            num_scalar_prefetch=0,
            grid=grid,
            in_specs=[
                pl.BlockSpec((1, TM), lambda m: (0, m)),            # tt
                pl.BlockSpec((1, TM), lambda m: (0, m)),            # ff
                pl.BlockSpec((Lp, 1), lambda m: (0, 0)),            # nu
                pl.BlockSpec((Lp, 1), lambda m: (0, 0)),            # tau
                pl.BlockSpec((2 * Lp, 2 * Ntp), lambda m: (0, 0)),  # Btx2
                pl.BlockSpec((2 * Nrp, 2 * Lp), lambda m: (0, 0)),  # Crx2
                pl.BlockSpec((B * 2 * Ntp, TM), lambda m: (0, m)),  # x
            ],
            out_specs=pl.BlockSpec((B * 2 * Nrp, TM), lambda m: (0, m)),
        ),
        compiler_params=pltpu.CompilerParams(
            dimension_semantics=("parallel",),
            vmem_limit_bytes=vmem_limit,
        ),
    )(tt, ff, nu, tau, Btx2, Crx2, x)

    y3 = y.reshape(B, 2 * Nrp, Mp)
    yr = y3[:, :Nr, :M].reshape(B, Nr, Nfft, Nsym)
    yi = y3[:, Nrp:Nrp + Nr, :M].reshape(B, Nr, Nfft, Nsym)
    return (yr + 1j * yi).astype(jnp.complex64)


# --------------------------------------------------------------------------
# Deterministic synthetic "module init" (no checkpoint): antenna arrays + MPC config.
# Generic3DAntennaArray.steering_matrix is synthesized as a standard 3D steering
# vector: a_p(az, el) = exp(j*2*pi * pos_p . u(az, el)), positions in wavelengths.
# --------------------------------------------------------------------------
def steering_matrix(positions, angles):
    az = angles[:, 0]
    el = angles[:, 1]
    u = jnp.stack([jnp.cos(el) * jnp.cos(az),
                   jnp.cos(el) * jnp.sin(az),
                   jnp.sin(el)], axis=-1)              # (L, 3)
    phase = TWO_PI * (u @ positions.T)                 # (L, P)
    return jnp.exp(1j * phase.astype(jnp.float32)).astype(jnp.complex64)


def reference_apply(signal_in, gains, delays, doppler, Arx, Atx, scs):
    """Pure-JAX re-implementation of the PyTorch forward (for validation)."""
    _, _, Nfft, Nsym = signal_in.shape
    A = jnp.einsum('l,li,lj->lij', gains, Arx, jnp.conj(Atx))
    t = jnp.arange(Nsym, dtype=jnp.float32) / scs
    f = jnp.arange(Nfft, dtype=jnp.float32) * scs
    phase = TWO_PI * (t[None, :, None] * doppler[None, None, :]
                      - f[:, None, None] * delays[None, None, :])   # (Nfft, Nsym, L)
    omega = jnp.exp(1j * phase.astype(jnp.float32))
    Hf = jnp.einsum('nkl,lij->ijlnk', omega, A)
    Hf = jnp.fft.fftshift(Hf, axes=-2)
    Hf = jnp.sum(Hf, axis=2)                                         # (Nr, Nt, Nfft, Nsym)
    return jnp.einsum('ijnk,bjnk->bink', Hf, signal_in)


def _make_case(B, Nt, Nr, Nfft, Nsym, L, seed):
    tx_pos = jnp.array([[0.0, 0.0, 0.0], [0.5, 0.0, 0.0],
                        [0.0, 0.5, 0.0], [0.5, 0.5, 0.0]], jnp.float32)[:Nt]
    rx_pos = (0.5 * jnp.arange(Nr, dtype=jnp.float32))[:, None] * jnp.array([1.0, 0.0, 0.0])

    k = jax.random.split(jax.random.PRNGKey(seed), 10)
    path_gains = ((jax.random.normal(k[0], (L,)) + 1j * jax.random.normal(k[1], (L,)))
                  / jnp.sqrt(2.0)).astype(jnp.complex64)
    path_delays = jax.random.uniform(k[2], (L,), minval=0.0, maxval=1e-6).astype(jnp.float32)
    doppler_shifts = jax.random.uniform(k[3], (L,), minval=-500.0, maxval=500.0).astype(jnp.float32)
    aods = jnp.stack([jax.random.uniform(k[4], (L,), minval=-math.pi, maxval=math.pi),
                      jax.random.uniform(k[5], (L,), minval=-math.pi / 2, maxval=math.pi / 2)], axis=-1)
    aoas = jnp.stack([jax.random.uniform(k[6], (L,), minval=-math.pi, maxval=math.pi),
                      jax.random.uniform(k[7], (L,), minval=-math.pi / 2, maxval=math.pi / 2)], axis=-1)
    Atx = steering_matrix(tx_pos, aods)    # (L, Nt)
    Arx = steering_matrix(rx_pos, aoas)    # (L, Nr)
    signal_in = (jax.random.normal(k[8], (B, Nt, Nfft, Nsym))
                 + 1j * jax.random.normal(k[9], (B, Nt, Nfft, Nsym))).astype(jnp.complex64)
    return signal_in, path_gains, path_delays, doppler_shifts, Arx, Atx


if __name__ == "__main__":
    scs = 120e3

    # Case 1: small shapes implied by the forward ([B, Nt, Nfft, Nsym]), single lane tile.
    args1 = _make_case(B=2, Nt=4, Nr=4, Nfft=16, Nsym=8, L=6, seed=0)
    out1 = jax.block_until_ready(ofdm_beamspace_channel_apply(*args1, scs))
    ref1 = reference_apply(*args1, scs)
    np.testing.assert_allclose(np.asarray(out1), np.asarray(ref1), rtol=5e-3, atol=5e-3)

    # Case 2: M not a multiple of 128 -> exercises lane padding + multi-step grid pipeline.
    args2 = _make_case(B=2, Nt=4, Nr=4, Nfft=20, Nsym=10, L=6, seed=3)
    out2 = jax.block_until_ready(
        ofdm_beamspace_channel_apply(*args2, scs, max_lane_tile=128))
    ref2 = reference_apply(*args2, scs)
    np.testing.assert_allclose(np.asarray(out2), np.asarray(ref2), rtol=5e-3, atol=5e-3)

    print("KERNEL_OK")
</pallas_src>

<mosaic_0001>
module attributes {stable_mosaic.version = 11 : i64} {
  func.func @_channel_apply_kernel(%arg0: i32, %arg1: memref<1x128xf32, #tpu.memory_space<vmem>>, %arg2: memref<1x128xf32, #tpu.memory_space<vmem>>, %arg3: memref<8x1xf32, #tpu.memory_space<vmem>>, %arg4: memref<8x1xf32, #tpu.memory_space<vmem>>, %arg5: memref<16x16xf32, #tpu.memory_space<vmem>>, %arg6: memref<16x16xf32, #tpu.memory_space<vmem>>, %arg7: memref<32x128xf32, #tpu.memory_space<vmem>>, %arg8: memref<32x128xf32, #tpu.memory_space<vmem>>) attributes {dimension_semantics = [#tpu.dimension_semantics<parallel>], iteration_bounds = array<i64: 1>, scalar_prefetch = 0 : i64, scratch_operands = 0 : i64, tpu.core_type = #tpu.core_type<tc>, window_params = [{transform_indices = @transform_0, window_bounds = array<i64: 1, 128>}, {transform_indices = @transform_1, window_bounds = array<i64: 1, 128>}, {pipeline_mode = #tpu.pipeline_mode<synchronous>, transform_indices = @transform_2, window_bounds = array<i64: 8, 1>}, {pipeline_mode = #tpu.pipeline_mode<synchronous>, transform_indices = @transform_3, window_bounds = array<i64: 8, 1>}, {pipeline_mode = #tpu.pipeline_mode<synchronous>, transform_indices = @transform_4, window_bounds = array<i64: 16, 16>}, {pipeline_mode = #tpu.pipeline_mode<synchronous>, transform_indices = @transform_5, window_bounds = array<i64: 16, 16>}, {transform_indices = @transform_6, window_bounds = array<i64: 32, 128>}, {transform_indices = @transform_7, window_bounds = array<i64: 32, 128>}]} {
    %c0 = arith.constant 0 : index
    %c0_0 = arith.constant 0 : index
    %0 = vector.load %arg1[%c0, %c0_0] : memref<1x128xf32, #tpu.memory_space<vmem>>, vector<1x128xf32>
    %c0_1 = arith.constant 0 : index
    %c0_2 = arith.constant 0 : index
    %1 = vector.load %arg2[%c0_1, %c0_2] : memref<1x128xf32, #tpu.memory_space<vmem>>, vector<1x128xf32>
    %c0_3 = arith.constant 0 : index
    %c0_4 = arith.constant 0 : index
    %2 = vector.load %arg3[%c0_3, %c0_4] : memref<8x1xf32, #tpu.memory_space<vmem>>, vector<8x1xf32>
    %c0_5 = arith.constant 0 : index
    %c0_6 = arith.constant 0 : index
    %3 = vector.load %arg4[%c0_5, %c0_6] : memref<8x1xf32, #tpu.memory_space<vmem>>, vector<8x1xf32>
    %4 = vector.broadcast %2 : vector<8x1xf32> to vector<8x128xf32>
    %5 = vector.broadcast %0 : vector<1x128xf32> to vector<8x128xf32>
    %6 = arith.mulf %4, %5 : vector<8x128xf32>
    %7 = vector.broadcast %3 : vector<8x1xf32> to vector<8x128xf32>
    %8 = vector.broadcast %1 : vector<1x128xf32> to vector<8x128xf32>
    %9 = arith.mulf %7, %8 : vector<8x128xf32>
    %10 = arith.subf %6, %9 : vector<8x128xf32>
    %cst = arith.constant 6.28318548 : f32
    %11 = vector.broadcast %cst : f32 to vector<8x128xf32>
    %12 = arith.mulf %11, %10 : vector<8x128xf32>
    %13 = math.cos %12 : vector<8x128xf32>
    %14 = math.sin %12 : vector<8x128xf32>
    %c0_7 = arith.constant 0 : index
    %c0_8 = arith.constant 0 : index
    %15 = vector.load %arg5[%c0_7, %c0_8] : memref<16x16xf32, #tpu.memory_space<vmem>>, vector<16x16xf32>
    %c0_9 = arith.constant 0 : index
    %c0_10 = arith.constant 0 : index
    %16 = vector.load %arg6[%c0_9, %c0_10] : memref<16x16xf32, #tpu.memory_space<vmem>>, vector<16x16xf32>
    %c0_11 = arith.constant 0 : index
    %c0_12 = arith.constant 0 : index
    %17 = vector.load %arg7[%c0_11, %c0_12] : memref<32x128xf32, #tpu.memory_space<vmem>>, vector<16x128xf32>
    %cst_13 = arith.constant dense<0.000000e+00> : vector<16x128xf32>
    %18 = tpu.matmul %15, %17, %cst_13 {dimension_numbers = #tpu.dot_dimension_numbers<[1], [0], [0], [1], [0, 0, 1, 1], [], []>} : vector<16x16xf32>, vector<16x128xf32>, vector<16x128xf32> -> vector<16x128xf32>
    %19 = vector.extract_strided_slice %18 {offsets = [0, 0], sizes = [8, 128], strides = [1, 1]} : vector<16x128xf32> to vector<8x128xf32>
    %20 = vector.extract_strided_slice %18 {offsets = [8, 0], sizes = [8, 128], strides = [1, 1]} : vector<16x128xf32> to vector<8x128xf32>
    %21 = arith.mulf %13, %19 : vector<8x128xf32>
    %22 = arith.mulf %14, %20 : vector<8x128xf32>
    %23 = arith.subf %21, %22 : vector<8x128xf32>
    %24 = arith.mulf %13, %20 : vector<8x128xf32>
    %25 = arith.mulf %14, %19 : vector<8x128xf32>
    %26 = arith.addf %24, %25 : vector<8x128xf32>
    %27 = tpu.concatenate %23, %26 in 0 : vector<8x128xf32>, vector<8x128xf32> -> vector<16x128xf32>
    %cst_14 = arith.constant dense<0.000000e+00> : vector<16x128xf32>
    %28 = tpu.matmul %16, %27, %cst_14 {dimension_numbers = #tpu.dot_dimension_numbers<[1], [0], [0], [1], [0, 0, 1, 1], [], []>} : vector<16x16xf32>, vector<16x128xf32>, vector<16x128xf32> -> vector<16x128xf32>
    %c0_15 = arith.constant 0 : index
    %c0_16 = arith.constant 0 : index
    %29 = vector.load %arg8[%c0_15, %c0_16] : memref<32x128xf32, #tpu.memory_space<vmem>>, vector<16x128xf32>
    tpu.vector_store %arg8[%c0_15, %c0_16], %28 {strides = array<i32>} : memref<32x128xf32, #tpu.memory_space<vmem>>, vector<16x128xf32>,
    %c16 = arith.constant 16 : index
    %c0_17 = arith.constant 0 : index
    %30 = vector.load %arg7[%c16, %c0_17] : memref<32x128xf32, #tpu.memory_space<vmem>>, vector<16x128xf32>
    %cst_18 = arith.constant dense<0.000000e+00> : vector<16x128xf32>
    %31 = tpu.matmul %15, %30, %cst_18 {dimension_numbers = #tpu.dot_dimension_numbers<[1], [0], [0], [1], [0, 0, 1, 1], [], []>} : vector<16x16xf32>, vector<16x128xf32>, vector<16x128xf32> -> vector<16x128xf32>
    %32 = vector.extract_strided_slice %31 {offsets = [0, 0], sizes = [8, 128], strides = [1, 1]} : vector<16x128xf32> to vector<8x128xf32>
    %33 = vector.extract_strided_slice %31 {offsets = [8, 0], sizes = [8, 128], strides = [1, 1]} : vector<16x128xf32> to vector<8x128xf32>
    %34 = arith.mulf %13, %32 : vector<8x128xf32>
    %35 = arith.mulf %14, %33 : vector<8x128xf32>
    %36 = arith.subf %34, %35 : vector<8x128xf32>
    %37 = arith.mulf %13, %33 : vector<8x128xf32>
    %38 = arith.mulf %14, %32 : vector<8x128xf32>
    %39 = arith.addf %37, %38 : vector<8x128xf32>
    %40 = tpu.concatenate %36, %39 in 0 : vector<8x128xf32>, vector<8x128xf32> -> vector<16x128xf32>
    %cst_19 = arith.constant dense<0.000000e+00> : vector<16x128xf32>
    %41 = tpu.matmul %16, %40, %cst_19 {dimension_numbers = #tpu.dot_dimension_numbers<[1], [0], [0], [1], [0, 0, 1, 1], [], []>} : vector<16x16xf32>, vector<16x128xf32>, vector<16x128xf32> -> vector<16x128xf32>
    %c16_20 = arith.constant 16 : index
    %c0_21 = arith.constant 0 : index
    %42 = vector.load %arg8[%c16_20, %c0_21] : memref<32x128xf32, #tpu.memory_space<vmem>>, vector<16x128xf32>
    tpu.vector_store %arg8[%c16_20, %c0_21], %41 {strides = array<i32>} : memref<32x128xf32, #tpu.memory_space<vmem>>, vector<16x128xf32>,
    return
  }
  func.func @transform_0(%arg0: i32) -> (i32, i32) {
    %c0_i32 = arith.constant 0 : i32
    %c0_i32_0 = arith.constant 0 : i32
    return %c0_i32, %arg0 : i32, i32
  }
  func.func @transform_1(%arg0: i32) -> (i32, i32) {
    %c0_i32 = arith.constant 0 : i32
    %c0_i32_0 = arith.constant 0 : i32
    return %c0_i32, %arg0 : i32, i32
  }
  func.func @transform_2(%arg0: i32) -> (i32, i32) {
    %c0_i32 = arith.constant 0 : i32
    %c0_i32_0 = arith.constant 0 : i32
    %c0_i32_1 = arith.constant 0 : i32
    return %c0_i32, %c0_i32_0 : i32, i32
  }
  func.func @transform_3(%arg0: i32) -> (i32, i32) {
    %c0_i32 = arith.constant 0 : i32
    %c0_i32_0 = arith.constant 0 : i32
    %c0_i32_1 = arith.constant 0 : i32
    return %c0_i32, %c0_i32_0 : i32, i32
  }
  func.func @transform_4(%arg0: i32) -> (i32, i32) {
    %c0_i32 = arith.constant 0 : i32
    %c0_i32_0 = arith.constant 0 : i32
    %c0_i32_1 = arith.constant 0 : i32
    return %c0_i32, %c0_i32_0 : i32, i32
  }
  func.func @transform_5(%arg0: i32) -> (i32, i32) {
    %c0_i32 = arith.constant 0 : i32
    %c0_i32_0 = arith.constant 0 : i32
    %c0_i32_1 = arith.constant 0 : i32
    return %c0_i32, %c0_i32_0 : i32, i32
  }
  func.func @transform_6(%arg0: i32) -> (i32, i32) {
    %c0_i32 = arith.constant 0 : i32
    %c0_i32_0 = arith.constant 0 : i32
    return %c0_i32, %arg0 : i32, i32
  }
  func.func @transform_7(%arg0: i32) -> (i32, i32) {
    %c0_i32 = arith.constant 0 : i32
    %c0_i32_0 = arith.constant 0 : i32
    return %c0_i32, %arg0 : i32, i32
  }
}

</mosaic_0001>

<bundles_post_ra>
// kernel: tpu_custom_call.1
= control target key start
LH: loop header
LB: loop body
LE: loop exit
PB: predicated region body
PF: predicated region fallthrough
CT: control target
= control target key end

     0   :  { %12 = vsyncpa [#allocation3], 0  ;;  %s917_s0 = inlined_call_operand.vmem [shape: f32[1,128], index: 0, kind: input, shape index: {}]   ;;  %s918_s1 = inlined_call_operand.vmem [shape: f32[1,128], index: 1, kind: input, shape index: {}]   ;;  %s919_s2 = inlined_call_operand.vmem [shape: f32[8,1], index: 2, kind: input, shape index: {}]   ;;  %s920_s3 = inlined_call_operand.vmem [shape: f32[8,1], index: 3, kind: input, shape index: {}]   ;;  %s921_s4 = inlined_call_operand.vmem [shape: f32[16,16], index: 4, kind: input, shape index: {}]   ;;  %s922_s5 = inlined_call_operand.hbm [shape: f32[16,16], index: 5, kind: input, shape index: {}]   ;;  %s923_s6 = inlined_call_operand.hbm [shape: f32[32,128], index: 6, kind: input, shape index: {}]   ;;  %s924_s7 = inlined_call_operand.hbm [shape: f32[32,128], index: 7, kind: output, shape index: {}]  }
   0x1   :  { %13 = vsyncpa [#allocation6], 0 }
   0x2   :  { %14 = vsyncpa [#allocation4], 0  ;;  %s796_s24 = smov [#allocation2]  }
   0x3   :  { %s30_s25 = sshll.u32 %s796_s24, 4  ;;  %s31_s25 = int_to_ptr.vmem [resolvable:$true] %s30_s25 }
   0x4   :  { %s738_s26 = scalar_lea.vmem %s31_s25, 256  ;;  %p743_p1 = scmp.lt.s32.totalorder %s31_s25, %s31_s25 }
   0x5   :  { %p739_p0 = scmp.ne.s32.totalorder %s31_s25, %s738_s26  ;;  %p744_p2 = scmp.lt.s32.totalorder %s738_s26, %s738_s26 }
   0x7   :  { %p745_p3 = por %p744_p2, %p743_p1 }
   0x9   :  { %p746_p4 = pnand %p745_p3, %p739_p0 }
   0xb   :  { %749 = shalt.err (!%p746_p4)
}
   0xc   :  { %s797_s27 = smov 128   ;;  %s798_s28 = smov 8  }
   0xd   :  { %36 = dma.hbm_to_vmem [thread:$0]  %s922_s5, 256, %s31_s25, [#allocation3], %s797_s27, %s797_s27, %s798_s28  }
   0xe   :  { %s799_s8 = smov [#allocation5]  }
   0xf   :  { %s42_s9 = sshll.u32 %s799_s8, 4  ;;  %s43_s9 = int_to_ptr.vmem [resolvable:$true] %s42_s9 }
  0x10   :  { %s758_s10 = scalar_lea.vmem %s43_s9, 512  ;;  %p763_p6 = scmp.lt.s32.totalorder %s43_s9, %s43_s9 }
  0x11   :  { %p759_p5 = scmp.ne.s32.totalorder %s43_s9, %s758_s10  ;;  %p764_p7 = scmp.lt.s32.totalorder %s758_s10, %s758_s10 }
  0x13   :  { %p765_p8 = por %p764_p7, %p763_p6 }
  0x15   :  { %p766_p9 = pnand %p765_p8, %p759_p5 }
  0x17   :  { %769 = shalt.err (!%p766_p9)
}
  0x18   :  { %48 = dma.hbm_to_vmem [thread:$0]  %s923_s6, 512, %s43_s9, [#allocation6], %s797_s27, %s797_s27, %s798_s28  }
  0x19   :  { %790 = dma.done.wait [#allocation3], 256  }
  0x1a   :  { %791 = vsyncadd [#allocation3], 4294967040 }
  0x1b   :  { %792 = dma.done.wait [#allocation6], 512  }
  0x1c   :  { %793 = vsyncadd [#allocation6], 4294966784  ;;  %v800_v0 = vmov 0   ;;  %vm298_vm0 = vcmask 130048   ;;  %v57_v1 = vld [vmem:[%s919_s2] sm:$0xff]  ;;  %v297_v2 = vld [vmem:[#allocation5 + $0x8] sm:$0xff] }
  0x1d   :  { %725 = vset.pattern.permute.xlu0 %v800_v0  ;;  %681 = vmatprep.subr.mxu0 %v297_v2  ;;  %v296_v3 = vld [vmem:[#allocation5] sm:$0xff]  ;;  %v292_v4 = vld [vmem:[%s921_s4] sm:$0xff]  ;;  %v293_v6 = vld [vmem:[%s921_s4 + $0x8] sm:$0xff]  ;;  %v801_v28 = vmov 683565275  }
  0x1e   :  { %61 = vperm.xlu0 %725, %v57_v1   ;;  %v58_v5 = vld [vmem:[%s920_s3] sm:$0xff]  ;;  %682 = vmatpush3.msra.mxu0 %v297_v2  ;;  %v470_v7 = vld [vmem:[#allocation5 + $0x18] sm:$0xff]  ;;  %v802_v30 = vmov 2475754826   ;;  %v803_v33 = vmov 2131351028  }
  0x1f   :  { %685 = vmatprep.mubr.msk.f32.mxu0 %vm298_vm0, %v292_v4  ;;  %683 = vmatprep.subr.mxu0 %v296_v3  ;;  %v469_v8 = vld [vmem:[#allocation5 + $0x10] sm:$0xff]  ;;  %v804_v36 = vmov 2102212464   ;;  %v805_v39 = vmov 920167782  }
  0x20   :  { %684 = vmatpush3.msra.mxu0 %v296_v3  ;;  %v876_v9 = vld [vmem:[#allocation2] sm:$0xff]  ;;  %v806_v42 = vmov 1326507024  }
  0x21   :  { %686 = vmatmul.mubr.msk.f32.vlgmr.msra.gmra.mxu0 %vm298_vm0, %v293_v6  ;;  %695 = vmatprep.subr.mxu0 %v470_v7  ;;  %v647_v11 = vld [vmem:[%s917_s0] ss:$0 sm:$0xff]  ;;  %s807_s0 = smov [#allocation7]  }
  0x22   :  { %73 = vperm.xlu0 %725, %v58_v5   ;;  %699 = vmatprep.mubr.msk.f32.mxu0 %vm298_vm0, %v292_v4  ;;  %v648_v12 = vld [vmem:[%s918_s1] ss:$0 sm:$0xff]  ;;  %s634_s1 = sshll.u32 %s807_s0, 4  ;;  %s635_s1 = int_to_ptr.vmem [resolvable:$true] %s634_s1 }
  0x23   :  { %696 = vmatpush3.msra.mxu0 %v470_v7  ;;  %692 = vmatprep.mubr.msk.f32.mxu1 %vm298_vm0, %v876_v9  ;;  %s770_s20 = scalar_lea.vmem %s635_s1, 512  ;;  %p775_p11 = scmp.lt.s32.totalorder %s635_s1, %s635_s1 }
  0x24   :  { %697 = vmatprep.subr.mxu0 %v469_v8  ;;  %p771_p10 = scmp.ne.s32.totalorder %s635_s1, %s770_s20  ;;  %p776_p12 = scmp.lt.s32.totalorder %s770_s20, %s770_s20 }
  0x25   :  { %698 = vmatpush3.msra.mxu0 %v469_v8 }
  0x26   :  { %700 = vmatmul.mubr.msk.f32.vlgmr.msra.gmra.mxu0 %vm298_vm0, %v293_v6  ;;  %p777_p13 = por %p776_p12, %p775_p11 }
  0x28   :  { %p778_p0 = pnand %p777_p13, %p771_p10 }
  0x99   :  { %v62_v10 = vpop.permute.xlu0 %61 }
  0x9a   :  { %v70_v14 = vmul.f32 %v647_v11, %v62_v10 }
  0x9d   :  { %v74_v13 = vpop.permute.xlu0 %73 }
  0x9e   :  { %v82_v15 = vmul.f32 %v648_v12, %v74_v13 }
  0xa0   :  { %v83_v16 = vsub.f32 %v70_v14, %v82_v15 }
  0xa2   :  { %v886_v17 = vmul.f32 6.2831855, %v83_v16 }
  0xa4   :  { %v88_v18 = vand.u32 2139095040, %v886_v17  ;;  %v85_v22 = vand.u32 2147483647, %v886_v17  ;;  %vm87_vm8 = vcmp.lt.s32.totalorder %v886_v17, 0 }
  0xa6   :  { %v89_v19 = vshrl.u32 %v88_v18, 23  ;;  %v92_v25 = vand.u32 8388607, %v85_v22  ;;  %vm86_vm9 = vcmp.le.f32.partialorder %v85_v22, 0.7853982 }
  0xa8   :  { %v649_v20 = vadd.s32 4294967169, %v89_v19  ;;  %v93_v44 = vor.u32 8388608, %v92_v25 }
  0xaa   :  { %v95_v21 = vadd.s32 1, %v649_v20  ;;  %v133_v58 = vshll.u32 %v93_v44, 8 }
  0xac   :  { %vm96_vm1 = vcmp.gt.s32.totalorder %v95_v21, 0 }
  0xad   :  { %v97_v23 = vsel %vm96_vm1, %v95_v21, 0  ;;  %vm177_vm1 = vweird.f32 %v886_v17 }
  0xae   :  { %v99_v24 = vand.u32 31, %v97_v23  ;;  %v98_v27 = vshrl.u32 %v97_v23, 5 }
  0xb0   :  { %v100_v26 = vsub.s32 32, %v99_v24  ;;  %v102_v29 = vshll.u32 %v801_v28, %v99_v24  ;;  %v105_v31 = vshll.u32 %v802_v30, %v99_v24  ;;  %v108_v35 = vshll.u32 %v803_v33, %v99_v24 }
  0xb1   :  { %v111_v38 = vshll.u32 %v804_v36, %v99_v24  ;;  %v114_v41 = vshll.u32 %v805_v39, %v99_v24  ;;  %vm117_vm2 = vcmp.lt.s32.totalorder %v98_v27, 1  ;;  %vm120_vm3 = vcmp.lt.s32.totalorder %v98_v27, 4 }
  0xb2   :  { %v103_v32 = vshrl.u32 %v802_v30, %v100_v26  ;;  %v106_v34 = vshrl.u32 %v803_v33, %v100_v26  ;;  %v109_v37 = vshrl.u32 %v804_v36, %v100_v26  ;;  %v112_v40 = vshrl.u32 %v805_v39, %v100_v26 }
  0xb3   :  { %v115_v43 = vshrl.u32 %v806_v42, %v100_v26  ;;  %v101_v53 = vshrl.u32 %v801_v28, %v100_v26  ;;  %vm119_vm4 = vcmp.lt.s32.totalorder %v98_v27, 3  ;;  %vm118_vm5 = vcmp.lt.s32.totalorder %v98_v27, 2 }
  0xb4   :  { %v104_v45 = vor.u32 %v103_v32, %v102_v29  ;;  %v107_v46 = vor.u32 %v106_v34, %v105_v31  ;;  %v110_v47 = vor.u32 %v109_v37, %v108_v35  ;;  %v113_v48 = vor.u32 %v112_v40, %v111_v38 }
  0xb5   :  { %v116_v49 = vor.u32 %v115_v43, %v114_v41 }
  0xb6   :  { %v122_v50 = vsel %vm120_vm3, %v110_v47, 2102212464  ;;  %v125_v51 = vsel %vm117_vm2, %v104_v45, %v107_v46  ;;  %v129_v52 = vsel %vm117_vm2, %v107_v46, %v110_v47  ;;  %v126_v54 = vsel %vm120_vm3, %v113_v48, 920167782 }
  0xb7   :  { %v130_v55 = vsel %vm120_vm3, %v116_v49, 1326507024  ;;  %v127_v56 = vsel %vm119_vm4, %v110_v47, %v126_v54  ;;  %v121_v59 = vsel %vm117_vm2, %v101_v53, %v104_v45  ;;  %v123_v60 = vsel %vm119_vm4, %v107_v46, %v122_v50 }
  0xb8   :  { %v131_v57 = vsel %vm119_vm4, %v113_v48, %v130_v55  ;;  %v128_v61 = vsel %vm118_vm5, %v125_v51, %v127_v56  ;;  %v124_v3 = vsel %vm118_vm5, %v121_v59, %v123_v60 }
  0xb9   :  { %v132_v62 = vsel %vm118_vm5, %v129_v52, %v131_v57  ;;  %v895_v1 = vmul.u32.u64.low %v133_v58, %v128_v61  ;;  %v896_v2 = vmul.u32.u64.high %v133_v58, %v128_v61, %v895_v1  ;;  %v140_v5 = vmul.u32 %v133_v58, %v124_v3 }
  0xba   :  { %v892_v63 = vmul.u32.u64.low %v133_v58, %v132_v62  ;;  %v893_v0 = vmul.u32.u64.high %v133_v58, %v132_v62, %v892_v63 }
  0xbb   :  { %v143_v4 = vadd.s32 1, %v896_v2 }
  0xbc   :  { %vm142_vm6 = vc.u32 %v893_v0, %v895_v1  ;;  %v141_v19 = vadd.s32 %v895_v1, %v893_v0 }
  0xbd   :  { %v144_v6 = vsel %vm142_vm6, %v143_v4, %v896_v2  ;;  %v295_v2 = vld [vmem:[#allocation2 + $0x8] sm:$0xff] }
  0xbe   :  { %v145_v7 = vadd.s32 %v144_v6, %v140_v5 }
  0xc0   :  { %v146_v8 = vadd.s32 536870912, %v145_v7 }
  0xc2   :  { %v147_v10 = vshrl.u32 %v146_v8, 30 }
  0xc4   :  { %v148_v11 = vshll.u32 %v147_v10, 30  ;;  %v171_v33 = vsub.s32 4, %v147_v10 }
  0xc6   :  { %v149_v12 = vsub.s32 %v145_v7, %v148_v11  ;;  %v172_v36 = vsel %vm87_vm8, %v171_v33, %v147_v10 }
  0xc7   :  { %v174_v37 = vsel %vm86_vm9, 0, %v172_v36 }
  0xc8   :  { %v151_v13 = vsub.s32 0, %v149_v12  ;;  %v281_v38 = vadd.s32 3, %v174_v37  ;;  %v178_v40 = vand.u32 3, %v174_v37 }
  0xca   :  { %v650_v14 = vmin.u32 %v151_v13, %v149_v12  ;;  %v282_v41 = vand.u32 3, %v281_v38  ;;  %vm183_vm10 = vcmp.eq.s32.totalorder %v178_v40, 2  ;;  %vm180_vm12 = vcmp.eq.s32.totalorder %v178_v40, 0 }
  0xcb   :  { %vm179_vm14 = vcmp.lt.s32.totalorder %v178_v40, 2 }
  0xcc   :  { %v153_v15 = vclz %v650_v14  ;;  %vm287_vm11 = vcmp.eq.s32.totalorder %v282_v41, 2  ;;  %vm284_vm13 = vcmp.eq.s32.totalorder %v282_v41, 0  ;;  %vm283_vm15 = vcmp.lt.s32.totalorder %v282_v41, 2 }
  0xce   :  { %v651_v16 = vadd.s32 4294967294, %v153_v15 }
  0xd0   :  { %vm652_vm7 = vcmp.lt.s32.totalorder %v651_v16, 0 }
  0xd1   :  { %v156_v18 = vsel %vm652_vm7, 0, %v651_v16 }
  0xd2   :  { %v157_v20 = vsub.s32 32, %v156_v18  ;;  %v161_v21 = vsub.s32 4294967266, %v156_v18  ;;  %v158_v23 = vshll.u32 %v149_v12, %v156_v18 }
  0xd4   :  { %v159_v24 = vshrl.u32 %v141_v19, %v157_v20  ;;  %v162_v25 = vadd.s32 127, %v161_v21 }
  0xd6   :  { %v160_v26 = vor.u32 %v159_v24, %v158_v23  ;;  %v163_v27 = vshll.u32 %v162_v25, 23 }
  0xd8   :  { %v164_v28 = vor.u32 4788187, %v163_v27  ;;  %v167_v30 = vcvt.s32.f32 %v160_v26 }
  0xda   :  { %v165_v29 = vand.u32 2147483647, %v164_v28 }
  0xdc   :  { %v168_v31 = vmul.f32 %v167_v30, %v165_v29 }
  0xde   :  { %v169_v32 = vxor.u32 2147483648, %v168_v31 }
  0xe0   :  { %v170_v34 = vsel %vm87_vm8, %v169_v32, %v168_v31 }
  0xe1   :  { %v173_v35 = vsel %vm86_vm9, %v886_v17, %v170_v34  ;;  %v687_v39 = vpop.f32.mrf.mxu0 }
  0xe2   :  { %726 = vcosq.f32 %v173_v35 }
  0xe3   :  { %728 = vsinq.f32 %v173_v35  ;;  %v371_v42 = vpop.f32.mrf.mxu0 }
  0xe6   :  { %v701_v47 = vpop.f32.mrf.mxu0 }
  0xe8   :  { %v537_v55 = vpop.f32.mrf.mxu0 }
  0xef   :  { %v727_v43 = vpop.eup %726 }
  0xf0   :  { %v729_v44 = vpop.eup %728  ;;  %v184_v45 = vxor.u32 2147483648, %v727_v43 }
  0xf1   :  { %v181_v46 = vxor.u32 2147483648, %v729_v44 }
  0xf2   :  { %v185_v22 = vsel %vm183_vm10, %v184_v45, %v729_v44  ;;  %v289_v48 = vsel %vm287_vm11, %v184_v45, %v729_v44 }
  0xf3   :  { %v182_v49 = vsel %vm180_vm12, %v727_v43, %v181_v46  ;;  %v286_v50 = vsel %vm284_vm13, %v727_v43, %v181_v46 }
  0xf4   :  { %v186_v51 = vsel %vm179_vm14, %v182_v49, %v185_v22  ;;  %v290_v52 = vsel %vm283_vm15, %v286_v50, %v289_v48 }
  0xf5   :  { %v187_v53 = vsel %vm177_vm1, nan, %v186_v51  ;;  %v291_v54 = vsel %vm177_vm1, nan, %v290_v52 }
  0xf6   :  { %v381_v56 = vmul.f32 %v687_v39, %v291_v54  ;;  %v383_v57 = vmul.f32 %v687_v39, %v187_v53  ;;  %v380_v58 = vmul.f32 %v371_v42, %v187_v53  ;;  %v384_v59 = vmul.f32 %v371_v42, %v291_v54 }
  0xf7   :  { %v549_v60 = vmul.f32 %v701_v47, %v187_v53  ;;  %v550_v61 = vmul.f32 %v537_v55, %v291_v54  ;;  %v547_v0 = vmul.f32 %v701_v47, %v291_v54  ;;  %v546_v1 = vmul.f32 %v537_v55, %v187_v53 }
  0xf8   :  { %v385_v62 = vadd.f32 %v384_v59, %v383_v57  ;;  %v382_v63 = vsub.f32 %v380_v58, %v381_v56 }
  0xf9   :  { %v551_v3 = vadd.f32 %v550_v61, %v549_v60  ;;  %v548_v17 = vsub.f32 %v546_v1, %v547_v0 }
  0xfa   :  { %688 = vmatprep.subr.mxu1 %v385_v62 }
  0xfb   :  { %689 = vmatpush3.msra.mxu1 %v385_v62 }
  0xfc   :  { %690 = vmatprep.subr.mxu1 %v382_v63 }
  0xfd   :  { %691 = vmatpush3.msra.mxu1 %v382_v63 }
  0xfe   :  { %693 = vmatmul.mubr.msk.f32.vlgmr.msra.gmra.mxu1 %vm298_vm0, %v295_v2  ;;  %702 = vmatprep.subr.mxu1 %v551_v3 }
  0xff   :  { %703 = vmatpush3.msra.mxu1 %v551_v3  ;;  %706 = vmatprep.mubr.msk.f32.mxu1 %vm298_vm0, %v876_v9 }
 0x100   :  { %704 = vmatprep.subr.mxu1 %v548_v17 }
 0x101   :  { %705 = vmatpush3.msra.mxu1 %v548_v17 }
 0x102   :  { %707 = vmatmul.mubr.msk.f32.vlgmr.msra.gmra.mxu1 %vm298_vm0, %v295_v2 }
 0x1be   :  { %v694_v4 = vpop.f32.mrf.mxu1 }
 0x1bf   :  { %468 = vst [vmem:[#allocation7 + $0x8] sm:$0xff] %v694_v4 }
 0x1c0   :  { %v458_v5 = vpop.f32.mrf.mxu1 }
 0x1c1   :  { %467 = vst [vmem:[#allocation7] sm:$0xff] %v458_v5 }
 0x1c2   :  { %v708_v6 = vpop.f32.mrf.mxu1 }
 0x1c3   :  { %628 = vst [vmem:[#allocation7 + $0x18] sm:$0xff] %v708_v6 }
 0x1c4   :  { %v618_v7 = vpop.f32.mrf.mxu1 }
 0x1c5   :  { %627 = vst [vmem:[#allocation7 + $0x10] sm:$0xff] %v618_v7 }
 0x1c6   :  { %781 = shalt.err (!%p778_p0)
}
 0x1c7   :  { %640 = dma.vmem_to_hbm [thread:$0]  %s635_s1, 512, %s924_s7, [#allocation4], %s797_s27, %s797_s27, %s798_s28  }
 0x1c8   :  { %794 = dma.done.wait [#allocation4], 512  }
 0x1c9   :  { %795 = vsyncadd [#allocation4], 4294966784 }
 0x1ca   :  { %644 = vsyncpa [#allocation3], 1 }
 0x1cb   :  { %645 = vsyncpa [#allocation6], 1 }
 0x1cc   :  { %646 = vsyncpa [#allocation4], 1 }

</bundles_post_ra>
